<compile_context>
chip_gen: v6e
topology: v6e:2x2x1
jax: 0.10.0
libtpu: 0.0.40
codegen_flags: <defaults>
</compile_context>

<pallas_src>
import numpy as np
import jax
import jax.numpy as jnp
from jax.experimental import pallas as pl
from jax.experimental.pallas import tpu as pltpu

LANE = 128
SUBLANE = 8


def _round_up(a, m):
    return (a + m - 1) // m * m


def _time_net_kernel(x_ref, w_ref, w1c_ref, w1s_ref, b1_ref, w2_ref, b2_ref, o_ref):
    # x_ref:   (TB, 1)      f32 timesteps
    # w_ref:   (1, half)    f32 sinusoidal frequencies
    # w1c_ref: (half, N)    bf16 = W1[:half]   (cos part)
    # w1s_ref: (half, N)    bf16 = W1[half:]   (sin part)
    # b1_ref:  (1, N)       f32
    # w2_ref:  (N, N)       bf16
    # b2_ref:  (1, N)       f32
    # o_ref:   (TB, N)      f32
    x = x_ref[...]                               # (TB, 1)
    w = w_ref[...]                               # (1, half)
    emb = x * w                                  # (TB, half)  == x[:,None] * w[None]

    cos_e = jnp.cos(emb).astype(jnp.bfloat16)
    sin_e = jnp.sin(emb).astype(jnp.bfloat16)

    # First Linear without the concat: two dots into one f32 accumulator.
    h = jnp.dot(cos_e, w1c_ref[...], preferred_element_type=jnp.float32)
    h = h + jnp.dot(sin_e, w1s_ref[...], preferred_element_type=jnp.float32)
    h = h + b1_ref[...]

    # SiLU in f32 (sigmoid hits the EUP slot — effectively free).
    h = h * jax.nn.sigmoid(h)

    out = jnp.dot(h.astype(jnp.bfloat16), w2_ref[...],
                  preferred_element_type=jnp.float32) + b2_ref[...]
    o_ref[...] = out.astype(o_ref.dtype)


def time_network(x, w, W1, b1, W2, b2, block_b=256):
    """x: (B,) float timesteps. Returns (B, out_dim) float32."""
    B = x.shape[0]
    time_dim, out_dim = W1.shape
    half = time_dim // 2

    # ---- pad out_dim to a multiple of 128 (lane-dense output, full MXU N) ----
    n_pad = (-out_dim) % LANE
    N = out_dim + n_pad
    W1p = jnp.pad(W1.astype(jnp.float32), ((0, 0), (0, n_pad)))
    b1p = jnp.pad(b1.astype(jnp.float32), ((0, n_pad),)).reshape(1, N)
    W2p = jnp.pad(W2.astype(jnp.float32), ((0, n_pad), (0, n_pad)))
    b2p = jnp.pad(b2.astype(jnp.float32), ((0, n_pad),)).reshape(1, N)

    # Split W1 into cos/sin halves (kills the in-kernel lane concat); bf16 MXU operands.
    W1c = W1p[:half].astype(jnp.bfloat16)        # (half, N)
    W1s = W1p[half:].astype(jnp.bfloat16)        # (half, N)
    W2b = W2p.astype(jnp.bfloat16)               # (N, N)

    # ---- batch tiling ----
    TB = min(block_b, _round_up(B, SUBLANE))
    Bp = _round_up(B, TB)
    xp = jnp.pad(x.astype(jnp.float32), ((0, Bp - B),)).reshape(Bp, 1)
    wr = w.reshape(1, half).astype(jnp.float32)

    grid = (Bp // TB,)

    out = pl.pallas_call(
        _time_net_kernel,
        out_shape=jax.ShapeDtypeStruct((Bp, N), jnp.float32),
        grid=grid,
        in_specs=[
            pl.BlockSpec((TB, 1), lambda i: (i, 0)),       # x tile
            pl.BlockSpec((1, half), lambda i: (0, 0)),     # frequencies (resident)
            pl.BlockSpec((half, N), lambda i: (0, 0)),     # W1 cos half (resident)
            pl.BlockSpec((half, N), lambda i: (0, 0)),     # W1 sin half (resident)
            pl.BlockSpec((1, N), lambda i: (0, 0)),        # b1 (resident)
            pl.BlockSpec((N, N), lambda i: (0, 0)),        # W2 (resident)
            pl.BlockSpec((1, N), lambda i: (0, 0)),        # b2 (resident)
        ],
        out_specs=pl.BlockSpec((TB, N), lambda i: (i, 0)),
        compiler_params=pltpu.CompilerParams(
            dimension_semantics=("parallel",),             # v7x: shard batch over 2 TCs
        ),
    )(xp, wr, W1c, W1s, b1p, W2b, b2p)

    return out[:B, :out_dim]


def make_params(time_dim, out_dim, key):
    assert time_dim % 2 == 0, "time_dim must be even!"
    half_dim = time_dim // 2
    # Exactly the PyTorch init for w:
    freq = np.log(10000) / (half_dim - 1)
    w = np.exp(np.arange(half_dim) * -freq).astype(np.float32)

    k1, k2, k3, k4 = jax.random.split(key, 4)
    # Deterministic synthetic Linear params (uniform, torch-default bound 1/sqrt(fan_in)).
    bound1 = 1.0 / np.sqrt(time_dim)
    bound2 = 1.0 / np.sqrt(out_dim)
    W1 = jax.random.uniform(k1, (time_dim, out_dim), jnp.float32, -bound1, bound1)
    b1 = jax.random.uniform(k2, (out_dim,), jnp.float32, -bound1, bound1)
    W2 = jax.random.uniform(k3, (out_dim, out_dim), jnp.float32, -bound2, bound2)
    b2 = jax.random.uniform(k4, (out_dim,), jnp.float32, -bound2, bound2)
    return jnp.asarray(w), W1, b1, W2, b2


def reference(x, w, W1, b1, W2, b2):
    emb = x[:, None] * w[None]
    feat = jnp.concatenate([jnp.cos(emb), jnp.sin(emb)], axis=1)
    h = feat @ W1 + b1
    h = h * jax.nn.sigmoid(h)
    return h @ W2 + b2


if __name__ == "__main__":
    # Small shapes consistent with the module's forward (1-D timestep array).
    # NOTE: at these toy sizes the kernel is launch/DMA overhead dominated; it pays
    # off for large B / out_dim (the grid + resident-weight layout handles that case).
    B, time_dim, out_dim = 8, 32, 32
    key = jax.random.PRNGKey(0)
    kx, kp = jax.random.split(key)
    x = jax.random.uniform(kx, (B,), jnp.float32, 0.0, 100.0)  # 1-D timestep array
    w, W1, b1, W2, b2 = make_params(time_dim, out_dim, kp)

    out = time_network(x, w, W1, b1, W2, b2)
    out = jax.block_until_ready(out)

    ref = reference(x, w, W1, b1, W2, b2)
    # bf16 MXU operands (f32 accumulation) -> looser tolerance than pure-f32.
    np.testing.assert_allclose(np.asarray(out), np.asarray(ref), rtol=2e-2, atol=2e-2)
    print("KERNEL_OK")
</pallas_src>

<mosaic_0001>
module attributes {stable_mosaic.version = 11 : i64} {
  func.func @_time_net_kernel(%arg0: i32, %arg1: memref<8x1xf32, #tpu.memory_space<vmem>>, %arg2: memref<1x16xf32, #tpu.memory_space<vmem>>, %arg3: memref<16x128xbf16, #tpu.memory_space<vmem>>, %arg4: memref<16x128xbf16, #tpu.memory_space<vmem>>, %arg5: memref<1x128xf32, #tpu.memory_space<vmem>>, %arg6: memref<128x128xbf16, #tpu.memory_space<vmem>>, %arg7: memref<1x128xf32, #tpu.memory_space<vmem>>, %arg8: memref<8x128xf32, #tpu.memory_space<vmem>>) attributes {dimension_semantics = [#tpu.dimension_semantics<parallel>], iteration_bounds = array<i64: 1>, scalar_prefetch = 0 : i64, scratch_operands = 0 : i64, tpu.core_type = #tpu.core_type<tc>, window_params = [{transform_indices = @transform_0, window_bounds = array<i64: 8, 1>}, {pipeline_mode = #tpu.pipeline_mode<synchronous>, transform_indices = @transform_1, window_bounds = array<i64: 1, 16>}, {pipeline_mode = #tpu.pipeline_mode<synchronous>, transform_indices = @transform_2, window_bounds = array<i64: 16, 128>}, {pipeline_mode = #tpu.pipeline_mode<synchronous>, transform_indices = @transform_3, window_bounds = array<i64: 16, 128>}, {pipeline_mode = #tpu.pipeline_mode<synchronous>, transform_indices = @transform_4, window_bounds = array<i64: 1, 128>}, {pipeline_mode = #tpu.pipeline_mode<synchronous>, transform_indices = @transform_5, window_bounds = array<i64: 128, 128>}, {pipeline_mode = #tpu.pipeline_mode<synchronous>, transform_indices = @transform_6, window_bounds = array<i64: 1, 128>}, {transform_indices = @transform_7, window_bounds = array<i64: 8, 128>}]} {
    %c0 = arith.constant 0 : index
    %c0_0 = arith.constant 0 : index
    %0 = vector.load %arg1[%c0, %c0_0] : memref<8x1xf32, #tpu.memory_space<vmem>>, vector<8x1xf32>
    %c0_1 = arith.constant 0 : index
    %c0_2 = arith.constant 0 : index
    %1 = vector.load %arg2[%c0_1, %c0_2] : memref<1x16xf32, #tpu.memory_space<vmem>>, vector<1x16xf32>
    %2 = vector.broadcast %0 : vector<8x1xf32> to vector<8x16xf32>
    %3 = vector.broadcast %1 : vector<1x16xf32> to vector<8x16xf32>
    %4 = arith.mulf %2, %3 : vector<8x16xf32>
    %5 = math.cos %4 : vector<8x16xf32>
    %6 = arith.truncf %5 : vector<8x16xf32> to vector<8x16xbf16>
    %7 = math.sin %4 : vector<8x16xf32>
    %8 = arith.truncf %7 : vector<8x16xf32> to vector<8x16xbf16>
    %c0_3 = arith.constant 0 : index
    %c0_4 = arith.constant 0 : index
    %9 = vector.load %arg3[%c0_3, %c0_4] : memref<16x128xbf16, #tpu.memory_space<vmem>>, vector<16x128xbf16>
    %cst = arith.constant dense<0.000000e+00> : vector<8x128xf32>
    %10 = tpu.matmul %6, %9, %cst {dimension_numbers = #tpu.dot_dimension_numbers<[1], [0], [0], [1], [0, 0, 1, 1], [], []>} : vector<8x16xbf16>, vector<16x128xbf16>, vector<8x128xf32> -> vector<8x128xf32>
    %c0_5 = arith.constant 0 : index
    %c0_6 = arith.constant 0 : index
    %11 = vector.load %arg4[%c0_5, %c0_6] : memref<16x128xbf16, #tpu.memory_space<vmem>>, vector<16x128xbf16>
    %cst_7 = arith.constant dense<0.000000e+00> : vector<8x128xf32>
    %12 = tpu.matmul %8, %11, %cst_7 {dimension_numbers = #tpu.dot_dimension_numbers<[1], [0], [0], [1], [0, 0, 1, 1], [], []>} : vector<8x16xbf16>, vector<16x128xbf16>, vector<8x128xf32> -> vector<8x128xf32>
    %13 = arith.addf %10, %12 : vector<8x128xf32>
    %c0_8 = arith.constant 0 : index
    %c0_9 = arith.constant 0 : index
    %14 = vector.load %arg5[%c0_8, %c0_9] : memref<1x128xf32, #tpu.memory_space<vmem>>, vector<1x128xf32>
    %15 = vector.broadcast %14 : vector<1x128xf32> to vector<8x128xf32>
    %16 = arith.addf %13, %15 : vector<8x128xf32>
    %17 = arith.negf %16 : vector<8x128xf32>
    %18 = math.exp %17 : vector<8x128xf32>
    %cst_10 = arith.constant 1.000000e+00 : f32
    %19 = vector.broadcast %cst_10 : f32 to vector<8x128xf32>
    %20 = arith.addf %19, %18 : vector<8x128xf32>
    %21 = arith.divf %19, %20 : vector<8x128xf32>
    %22 = arith.mulf %16, %21 : vector<8x128xf32>
    %23 = arith.truncf %22 : vector<8x128xf32> to vector<8x128xbf16>
    %c0_11 = arith.constant 0 : index
    %c0_12 = arith.constant 0 : index
    %24 = vector.load %arg6[%c0_11, %c0_12] : memref<128x128xbf16, #tpu.memory_space<vmem>>, vector<128x128xbf16>
    %cst_13 = arith.constant dense<0.000000e+00> : vector<8x128xf32>
    %25 = tpu.matmul %23, %24, %cst_13 {dimension_numbers = #tpu.dot_dimension_numbers<[1], [0], [0], [1], [0, 0, 1, 1], [], []>} : vector<8x128xbf16>, vector<128x128xbf16>, vector<8x128xf32> -> vector<8x128xf32>
    %c0_14 = arith.constant 0 : index
    %c0_15 = arith.constant 0 : index
    %26 = vector.load %arg7[%c0_14, %c0_15] : memref<1x128xf32, #tpu.memory_space<vmem>>, vector<1x128xf32>
    %27 = vector.broadcast %26 : vector<1x128xf32> to vector<8x128xf32>
    %28 = arith.addf %25, %27 : vector<8x128xf32>
    %c0_16 = arith.constant 0 : index
    %c0_17 = arith.constant 0 : index
    %29 = vector.load %arg8[%c0_16, %c0_17] : memref<8x128xf32, #tpu.memory_space<vmem>>, vector<8x128xf32>
    tpu.vector_store %arg8[%c0_16, %c0_17], %28 {strides = array<i32>} : memref<8x128xf32, #tpu.memory_space<vmem>>, vector<8x128xf32>,
    return
  }
  func.func @transform_0(%arg0: i32) -> (i32, i32) {
    %c0_i32 = arith.constant 0 : i32
    %c0_i32_0 = arith.constant 0 : i32
    return %arg0, %c0_i32 : i32, i32
  }
  func.func @transform_1(%arg0: i32) -> (i32, i32) {
    %c0_i32 = arith.constant 0 : i32
    %c0_i32_0 = arith.constant 0 : i32
    %c0_i32_1 = arith.constant 0 : i32
    return %c0_i32, %c0_i32_0 : i32, i32
  }
  func.func @transform_2(%arg0: i32) -> (i32, i32) {
    %c0_i32 = arith.constant 0 : i32
    %c0_i32_0 = arith.constant 0 : i32
    %c0_i32_1 = arith.constant 0 : i32
    return %c0_i32, %c0_i32_0 : i32, i32
  }
  func.func @transform_3(%arg0: i32) -> (i32, i32) {
    %c0_i32 = arith.constant 0 : i32
    %c0_i32_0 = arith.constant 0 : i32
    %c0_i32_1 = arith.constant 0 : i32
    return %c0_i32, %c0_i32_0 : i32, i32
  }
  func.func @transform_4(%arg0: i32) -> (i32, i32) {
    %c0_i32 = arith.constant 0 : i32
    %c0_i32_0 = arith.constant 0 : i32
    %c0_i32_1 = arith.constant 0 : i32
    return %c0_i32, %c0_i32_0 : i32, i32
  }
  func.func @transform_5(%arg0: i32) -> (i32, i32) {
    %c0_i32 = arith.constant 0 : i32
    %c0_i32_0 = arith.constant 0 : i32
    %c0_i32_1 = arith.constant 0 : i32
    return %c0_i32, %c0_i32_0 : i32, i32
  }
  func.func @transform_6(%arg0: i32) -> (i32, i32) {
    %c0_i32 = arith.constant 0 : i32
    %c0_i32_0 = arith.constant 0 : i32
    %c0_i32_1 = arith.constant 0 : i32
    return %c0_i32, %c0_i32_0 : i32, i32
  }
  func.func @transform_7(%arg0: i32) -> (i32, i32) {
    %c0_i32 = arith.constant 0 : i32
    %c0_i32_0 = arith.constant 0 : i32
    return %arg0, %c0_i32 : i32, i32
  }
}

</mosaic_0001>

<bundles_post_ra>
// kernel: tpu_custom_call.1
= control target key start
LH: loop header
LB: loop body
LE: loop exit
PB: predicated region body
PF: predicated region fallthrough
CT: control target
= control target key end

     0   :  { %12 = vsyncpa [#allocation3], 0  ;;  %s813_s0 = inlined_call_operand.vmem [shape: f32[8,1], index: 0, kind: input, shape index: {}]   ;;  %s814_s1 = inlined_call_operand.vmem [shape: f32[1,16], index: 1, kind: input, shape index: {}]   ;;  %s815_s2 = inlined_call_operand.vmem [shape: bf16[16,128], index: 2, kind: input, shape index: {}]   ;;  %s816_s3 = inlined_call_operand.hbm [shape: bf16[16,128], index: 3, kind: input, shape index: {}]   ;;  %s817_s4 = inlined_call_operand.vmem [shape: f32[1,128], index: 4, kind: input, shape index: {}]   ;;  %s818_s5 = inlined_call_operand.hbm [shape: bf16[128,128], index: 5, kind: input, shape index: {}]   ;;  %s819_s6 = inlined_call_operand.vmem [shape: f32[1,128], index: 6, kind: input, shape index: {}]   ;;  %s820_s7 = inlined_call_operand.hbm [shape: f32[8,128], index: 7, kind: output, shape index: {}]  }
   0x1   :  { %13 = vsyncpa [#allocation6], 0 }
   0x2   :  { %14 = vsyncpa [#allocation4], 0  ;;  %s698_s24 = smov [#allocation2]  }
   0x3   :  { %s26_s25 = sshll.u32 %s698_s24, 4  ;;  %s27_s25 = int_to_ptr.vmem [resolvable:$true] %s26_s25 }
   0x4   :  { %s640_s26 = scalar_lea.vmem %s27_s25, 128  ;;  %p645_p1 = scmp.lt.s32.totalorder %s27_s25, %s27_s25 }
   0x5   :  { %p641_p0 = scmp.ne.s32.totalorder %s27_s25, %s640_s26  ;;  %p646_p2 = scmp.lt.s32.totalorder %s640_s26, %s640_s26 }
   0x7   :  { %p647_p3 = por %p646_p2, %p645_p1 }
   0x9   :  { %p648_p4 = pnand %p647_p3, %p641_p0 }
   0xb   :  { %651 = shalt.err (!%p648_p4)
}
   0xc   :  { %s699_s27 = smov 64   ;;  %s700_s28 = smov 4  }
   0xd   :  { %32 = dma.hbm_to_vmem [thread:$0]  %s816_s3, 128, %s27_s25, [#allocation3], %s699_s27, %s699_s27, %s700_s28  }
   0xe   :  { %s701_s8 = smov [#allocation5]  }
   0xf   :  { %s40_s9 = sshll.u32 %s701_s8, 4  ;;  %s41_s9 = int_to_ptr.vmem [resolvable:$true] %s40_s9 }
  0x10   :  { %s660_s10 = scalar_lea.vmem %s41_s9, 1024  ;;  %p665_p6 = scmp.lt.s32.totalorder %s41_s9, %s41_s9 }
  0x11   :  { %p661_p5 = scmp.ne.s32.totalorder %s41_s9, %s660_s10  ;;  %p666_p7 = scmp.lt.s32.totalorder %s660_s10, %s660_s10 }
  0x13   :  { %p667_p8 = por %p666_p7, %p665_p6 }
  0x15   :  { %p668_p9 = pnand %p667_p8, %p661_p5 }
  0x17   :  { %671 = shalt.err (!%p668_p9)
}
  0x18   :  { %46 = dma.hbm_to_vmem [thread:$0]  %s818_s5, 1024, %s41_s9, [#allocation6], %s699_s27, %s699_s27, %s700_s28  }
  0x19   :  { %692 = dma.done.wait [#allocation3], 128  }
  0x1a   :  { %693 = vsyncadd [#allocation3], 4294967168 }
  0x1b   :  { %694 = dma.done.wait [#allocation6], 1024  }
  0x1c   :  { %695 = vsyncadd [#allocation6], 4294966272  ;;  %v702_v0 = vmov 0   ;;  %v56_v1 = vld [vmem:[%s813_s0] sm:$0xff]  ;;  %v703_v3 = vmov 0.0   ;;  %vm704_vm0 = vmmov 0  }
  0x1d   :  { %613 = vset.pattern.permute.xlu0 %v702_v0  ;;  %v614_v2 = vld [vmem:[#allocation2] sm:$0xff]   ;;  %563 = vmatprep.subr.bf16.mxu1 %v703_v3  ;;  %v705_v17 = vmov 683565275   ;;  %v706_v19 = vmov 2475754826   ;;  %s711_s18 = smov [#allocation7]  }
  0x1e   :  { %60 = vperm.xlu0 %613, %v56_v1   ;;  %565 = vmatprep.mubr.msk.bf16.mxu1 %vm704_vm0, %v703_v3  ;;  %v526_v4 = vld [vmem:[%s814_s1] ss:$0 sm:$0xff]  ;;  %v707_v22 = vmov 2131351028   ;;  %v708_v25 = vmov 2102212464  }
  0x1f   :  { %564 = vmatpush3.bf16.msra.mxu1 %v614_v2  ;;  %575 = vmatprep.subr.bf16.mxu0 %v703_v3  ;;  %v709_v28 = vmov 920167782   ;;  %v710_v31 = vmov 1326507024  }
  0x20   :  { %569 = vmatprep.subr.bf16.mxu1 %v703_v3  ;;  %591 = vmatprep.mubr.msk.bf16.mxu0 %vm704_vm0, %v703_v3 }
  0x99   :  { %v61_v5 = vpop.permute.xlu0 %60 }
  0x9a   :  { %v771_v6 = vmul.f32 %v526_v4, %v61_v5 }
  0x9c   :  { %v73_v7 = vand.u32 2139095040, %v771_v6  ;;  %v70_v11 = vand.u32 2147483647, %v771_v6  ;;  %vm72_vm8 = vcmp.lt.s32.totalorder %v771_v6, 0  ;;  %vm162_vm13 = vweird.f32 %v771_v6 }
  0x9e   :  { %v74_v8 = vshrl.u32 %v73_v7, 23  ;;  %v77_v14 = vand.u32 8388607, %v70_v11  ;;  %vm71_vm9 = vcmp.le.f32.partialorder %v70_v11, 0.7853982 }
  0xa0   :  { %v527_v9 = vadd.s32 4294967169, %v74_v8  ;;  %v78_v33 = vor.u32 8388608, %v77_v14 }
  0xa2   :  { %v80_v10 = vadd.s32 1, %v527_v9  ;;  %v118_v47 = vshll.u32 %v78_v33, 8 }
  0xa4   :  { %vm81_vm1 = vcmp.gt.s32.totalorder %v80_v10, 0 }
  0xa5   :  { %v82_v12 = vsel %vm81_vm1, %v80_v10, 0  ;;  %vm289_vm1 = vcmask 130048  }
  0xa6   :  { %v84_v13 = vand.u32 31, %v82_v12  ;;  %v83_v16 = vshrl.u32 %v82_v12, 5 }
  0xa8   :  { %v85_v15 = vsub.s32 32, %v84_v13  ;;  %v87_v18 = vshll.u32 %v705_v17, %v84_v13  ;;  %v90_v20 = vshll.u32 %v706_v19, %v84_v13  ;;  %v93_v24 = vshll.u32 %v707_v22, %v84_v13 }
  0xa9   :  { %v96_v27 = vshll.u32 %v708_v25, %v84_v13  ;;  %v99_v30 = vshll.u32 %v709_v28, %v84_v13  ;;  %vm102_vm2 = vcmp.lt.s32.totalorder %v83_v16, 1  ;;  %vm105_vm3 = vcmp.lt.s32.totalorder %v83_v16, 4 }
  0xaa   :  { %v88_v21 = vshrl.u32 %v706_v19, %v85_v15  ;;  %v91_v23 = vshrl.u32 %v707_v22, %v85_v15  ;;  %v94_v26 = vshrl.u32 %v708_v25, %v85_v15  ;;  %v97_v29 = vshrl.u32 %v709_v28, %v85_v15 }
  0xab   :  { %v100_v32 = vshrl.u32 %v710_v31, %v85_v15  ;;  %v86_v42 = vshrl.u32 %v705_v17, %v85_v15  ;;  %vm104_vm4 = vcmp.lt.s32.totalorder %v83_v16, 3  ;;  %vm103_vm5 = vcmp.lt.s32.totalorder %v83_v16, 2 }
  0xac   :  { %v89_v34 = vor.u32 %v88_v21, %v87_v18  ;;  %v92_v35 = vor.u32 %v91_v23, %v90_v20  ;;  %v95_v36 = vor.u32 %v94_v26, %v93_v24  ;;  %v98_v37 = vor.u32 %v97_v29, %v96_v27 }
  0xad   :  { %v101_v38 = vor.u32 %v100_v32, %v99_v30 }
  0xae   :  { %v107_v39 = vsel %vm105_vm3, %v95_v36, 2102212464  ;;  %v110_v40 = vsel %vm102_vm2, %v89_v34, %v92_v35  ;;  %v114_v41 = vsel %vm102_vm2, %v92_v35, %v95_v36  ;;  %v111_v43 = vsel %vm105_vm3, %v98_v37, 920167782 }
  0xaf   :  { %v115_v44 = vsel %vm105_vm3, %v101_v38, 1326507024  ;;  %v112_v45 = vsel %vm104_vm4, %v95_v36, %v111_v43  ;;  %v106_v48 = vsel %vm102_vm2, %v86_v42, %v89_v34  ;;  %v108_v49 = vsel %vm104_vm4, %v92_v35, %v107_v39  ;;  %v615_v39 = vld [vmem:[%s815_s2] sm:$0xff]  }
  0xb0   :  { %v116_v46 = vsel %vm104_vm4, %v98_v37, %v115_v44  ;;  %v113_v50 = vsel %vm103_vm5, %v110_v40, %v112_v45  ;;  %v109_v56 = vsel %vm103_vm5, %v106_v48, %v108_v49  ;;  %v616_v43 = vld [vmem:[#allocation5 + $0x38] sm:$0xff]   ;;  %v617_v44 = vld [vmem:[#allocation5 + $0x30] sm:$0xff]   ;;  %v618_v45 = vld [vmem:[#allocation5 + $0x28] sm:$0xff]  }
  0xb1   :  { %v117_v51 = vsel %vm103_vm5, %v114_v41, %v116_v46  ;;  %v780_v54 = vmul.u32.u64.low %v118_v47, %v113_v50  ;;  %v781_v55 = vmul.u32.u64.high %v118_v47, %v113_v50, %v780_v54  ;;  %v125_v58 = vmul.u32 %v118_v47, %v109_v56  ;;  %576 = vmatpush3.bf16.msra.mxu0 %v616_v43  ;;  %v619_v46 = vld [vmem:[#allocation5 + $0x20] sm:$0xff]   ;;  %v621_v48 = vld [vmem:[#allocation5 + $0x10] sm:$0xff]   ;;  %v622_v49 = vld [vmem:[#allocation5 + $0x8] sm:$0xff]  }
  0xb2   :  { %v777_v52 = vmul.u32.u64.low %v118_v47, %v117_v51  ;;  %v778_v53 = vmul.u32.u64.high %v118_v47, %v117_v51, %v777_v52  ;;  %577 = vmatprep.subr.bf16.mxu0 %v703_v3  ;;  %v620_v47 = vld [vmem:[#allocation5 + $0x18] sm:$0xff]   ;;  %v623_v50 = vld [vmem:[#allocation5] sm:$0xff]  }
  0xb3   :  { %v128_v57 = vadd.s32 1, %v781_v55  ;;  %v539_v56 = vld [vmem:[%s817_s4] ss:$0 sm:$0xff]  ;;  %s516_s4 = sshll.u32 %s711_s18, 4  ;;  %s517_s4 = int_to_ptr.vmem [resolvable:$true] %s516_s4 }
  0xb4   :  { %vm127_vm6 = vc.u32 %v778_v53, %v780_v54  ;;  %v126_v8 = vadd.s32 %v780_v54, %v778_v53  ;;  %s672_s19 = scalar_lea.vmem %s517_s4, 128  ;;  %p677_p11 = scmp.lt.s32.totalorder %s517_s4, %s517_s4 }
  0xb5   :  { %v129_v59 = vsel %vm127_vm6, %v128_v57, %v781_v55  ;;  %578 = vmatpush3.bf16.msra.mxu0 %v617_v44  ;;  %p673_p10 = scmp.ne.s32.totalorder %s517_s4, %s672_s19  ;;  %p678_p12 = scmp.lt.s32.totalorder %s672_s19, %s672_s19 }
  0xb6   :  { %v130_v60 = vadd.s32 %v129_v59, %v125_v58  ;;  %579 = vmatprep.subr.bf16.mxu0 %v703_v3 }
  0xb7   :  { %p679_p13 = por %p678_p12, %p677_p11 }
  0xb8   :  { %v131_v61 = vadd.s32 536870912, %v130_v60 }
  0xb9   :  { %580 = vmatpush3.bf16.msra.mxu0 %v618_v45  ;;  %p680_p0 = pnand %p679_p13, %p673_p10 }
  0xba   :  { %v132_v62 = vshrl.u32 %v131_v61, 30  ;;  %581 = vmatprep.subr.bf16.mxu0 %v703_v3 }
  0xbc   :  { %v133_v63 = vshll.u32 %v132_v62, 30  ;;  %v156_v22 = vsub.s32 4, %v132_v62 }
  0xbd   :  { %582 = vmatpush3.bf16.msra.mxu0 %v619_v46 }
  0xbe   :  { %v134_v0 = vsub.s32 %v130_v60, %v133_v63  ;;  %v157_v25 = vsel %vm72_vm8, %v156_v22, %v132_v62  ;;  %583 = vmatprep.subr.bf16.mxu0 %v703_v3 }
  0xbf   :  { %v159_v26 = vsel %vm71_vm9, 0, %v157_v25 }
  0xc0   :  { %v136_v1 = vsub.s32 0, %v134_v0  ;;  %v267_v27 = vadd.s32 3, %v159_v26  ;;  %v163_v31 = vand.u32 3, %v159_v26 }
  0xc1   :  { %584 = vmatpush3.bf16.msra.mxu0 %v620_v47 }
  0xc2   :  { %v528_v2 = vmin.u32 %v136_v1, %v134_v0  ;;  %v268_v28 = vand.u32 3, %v267_v27  ;;  %vm165_vm14 = vcmp.eq.s32.totalorder %v163_v31, 0  ;;  %vm168_vm15 = vcmp.eq.s32.totalorder %v163_v31, 2  ;;  %585 = vmatprep.subr.bf16.mxu0 %v703_v3 }
  0xc3   :  { %vm164_vm2 = vcmp.lt.s32.totalorder %v163_v31, 2 }
  0xc4   :  { %v138_v4 = vclz %v528_v2  ;;  %vm273_vm10 = vcmp.eq.s32.totalorder %v268_v28, 2  ;;  %vm270_vm11 = vcmp.eq.s32.totalorder %v268_v28, 0  ;;  %vm269_vm12 = vcmp.lt.s32.totalorder %v268_v28, 2 }
  0xc5   :  { %586 = vmatpush3.bf16.msra.mxu0 %v621_v48 }
  0xc6   :  { %v529_v5 = vadd.s32 4294967294, %v138_v4  ;;  %587 = vmatprep.subr.bf16.mxu0 %v703_v3  ;;  %v541_v4 = vld [vmem:[%s819_s6] ss:$0 sm:$0xff] }
  0xc8   :  { %vm530_vm7 = vcmp.lt.s32.totalorder %v529_v5, 0 }
  0xc9   :  { %v141_v7 = vsel %vm530_vm7, 0, %v529_v5  ;;  %588 = vmatpush3.bf16.msra.mxu0 %v622_v49 }
  0xca   :  { %v142_v9 = vsub.s32 32, %v141_v7  ;;  %v146_v10 = vsub.s32 4294967266, %v141_v7  ;;  %v143_v12 = vshll.u32 %v134_v0, %v141_v7  ;;  %589 = vmatprep.subr.bf16.mxu0 %v703_v3 }
  0xcc   :  { %v144_v13 = vshrl.u32 %v126_v8, %v142_v9  ;;  %v147_v14 = vadd.s32 127, %v146_v10 }
  0xcd   :  { %590 = vmatpush3.bf16.msra.mxu0 %v623_v50 }
  0xce   :  { %v145_v15 = vor.u32 %v144_v13, %v143_v12  ;;  %v148_v16 = vshll.u32 %v147_v14, 23 }
  0xd0   :  { %v149_v17 = vor.u32 4788187, %v148_v16  ;;  %v152_v19 = vcvt.s32.f32 %v145_v15 }
  0xd2   :  { %v150_v18 = vand.u32 2147483647, %v149_v17 }
  0xd4   :  { %v153_v20 = vmul.f32 %v152_v19, %v150_v18 }
  0xd6   :  { %v154_v21 = vxor.u32 2147483648, %v153_v20 }
  0xd8   :  { %v155_v23 = vsel %vm72_vm8, %v154_v21, %v153_v20 }
  0xd9   :  { %v158_v24 = vsel %vm71_vm9, %v771_v6, %v155_v23 }
  0xda   :  { %624 = vcosq.f32 %v158_v24 }
  0xdb   :  { %626 = vsinq.f32 %v158_v24 }
  0xe7   :  { %v625_v29 = vpop.eup %624 }
  0xe8   :  { %v627_v30 = vpop.eup %626  ;;  %v169_v32 = vxor.u32 2147483648, %v625_v29 }
  0xe9   :  { %v166_v33 = vxor.u32 2147483648, %v627_v30 }
  0xea   :  { %v275_v34 = vsel %vm273_vm10, %v169_v32, %v627_v30  ;;  %v170_v37 = vsel %vm168_vm15, %v169_v32, %v627_v30 }
  0xeb   :  { %v272_v35 = vsel %vm270_vm11, %v625_v29, %v166_v33  ;;  %v167_v36 = vsel %vm165_vm14, %v625_v29, %v166_v33 }
  0xec   :  { %v276_v11 = vsel %vm269_vm12, %v272_v35, %v275_v34  ;;  %v171_v41 = vsel %vm164_vm2, %v167_v36, %v170_v37 }
  0xed   :  { %v277_v38 = vsel %vm162_vm13, nan, %v276_v11  ;;  %v172_v6 = vsel %vm162_vm13, nan, %v171_v41 }
  0xee   :  { %v278_v40 = vpack.c.bf16 %v277_v38, %v277_v38  ;;  %v173_v42 = vpack.c.bf16 %v172_v6, %v172_v6 }
  0xf0   :  { %566 = vmatmul.mubr.msk.bf16.vlgmr.msra.gmra.mxu1 %vm289_vm1, %v278_v40 }
  0xf1   :  { %570 = vmatpush3.bf16.msra.mxu1 %v615_v39  ;;  %571 = vmatprep.mubr.msk.bf16.mxu1 %vm704_vm0, %v703_v3 }
  0xf8   :  { %572 = vmatmul.mubr.msk.bf16.vlgmr.msra.gmra.mxu1 %vm289_vm1, %v173_v42 }
 0x1b0   :  { %v327_v51 = vpop.f32.mrf.mxu1 }
 0x1b2   :  { %v567_v52 = vpop.f32.mrf.mxu1 }
 0x1b4   :  { %v330_v53 = vpop.f32.mrf.mxu1 }
 0x1b6   :  { %v568_v54 = vpop.f32.mrf.mxu1 }
 0x1b8   :  { %v376_v55 = vpop.f32.mrf.mxu1 }
 0x1b9   :  { %v377_v57 = vadd.f32 %v376_v55, %v327_v51 }
 0x1ba   :  { %v573_v58 = vpop.f32.mrf.mxu1 }
 0x1bb   :  { %v389_v59 = vadd.f32 %v539_v56, %v377_v57 }
 0x1bc   :  { %v379_v60 = vpop.f32.mrf.mxu1 }
 0x1bd   :  { %v540_v61 = vmul.f32 -1.442695, %v389_v59 }
 0x1be   :  { %v574_v62 = vpop.f32.mrf.mxu1 }
 0x1bf   :  { %628 = vpow2.f32 %v540_v61 }
 0x1cc   :  { %v629_v63 = vpop.eup %628 }
 0x1cd   :  { %v393_v0 = vadd.f32 1.0, %v629_v63 }
 0x1cf   :  { %630 = vrcp.f32 %v393_v0 }
 0x1dc   :  { %v631_v3 = vpop.eup %630 }
 0x1dd   :  { %v396_v1 = vmul.f32 %v631_v3, %v389_v59 }
 0x1df   :  { %v397_v2 = vpack.c.bf16 %v396_v1, %v396_v1 }
 0x1e1   :  { %592 = vmatmul.mubr.bf16.vlgmr.msra.gmra.mxu0 %v397_v2 }
 0x2a1   :  { %v503_v5 = vpop.f32.mrf.mxu0 }
 0x2a2   :  { %v504_v7 = vadd.f32 %v541_v4, %v503_v5 }
 0x2a3   :  { %v593_v8 = vpop.f32.mrf.mxu0 }
 0x2a4   :  { %509 = vst [vmem:[#allocation7] sm:$0xff] %v504_v7 }
 0x2a5   :  { %v506_v9 = vpop.f32.mrf.mxu0 }
 0x2a6   :  { %683 = shalt.err (!%p680_p0)
}
 0x2a7   :  { %519 = dma.vmem_to_hbm [thread:$0]  %s517_s4, 128, %s820_s7, [#allocation4]   ;;  %v594_v10 = vpop.f32.mrf.mxu0 }
 0x2a8   :  { %696 = dma.done.wait [#allocation4], 128  }
 0x2a9   :  { %697 = vsyncadd [#allocation4], 4294967168 }
 0x2aa   :  { %523 = vsyncpa [#allocation3], 1 }
 0x2ab   :  { %524 = vsyncpa [#allocation6], 1 }
 0x2ac   :  { %525 = vsyncpa [#allocation4], 1 }

</bundles_post_ra>
